<compile_context>
chip_gen: v7x
topology: tpu7x:2x2x1
jax: 0.10.0
libtpu: 0.0.40
codegen_flags: <defaults>
</compile_context>

<pallas_src>
import numpy as np
import jax
import jax.numpy as jnp
from jax.experimental import pallas as pl
from jax.experimental.pallas import tpu as pltpu


def _round_up(n, m):
    return ((n + m - 1) // m) * m


def _cdiv(a, b):
    return (a + b - 1) // b


# ----------------------------------------------------------------------------
# Kernel: fused 3-layer MLP over one (TB, state_dim) batch tile.
# f32 operands, f32 MXU accumulation, f32 bias/ReLU epilogue (v5e-safe).
# The only narrowing is the final bf16 store (halves output HBM writeback).
# ----------------------------------------------------------------------------
def qnet_kernel(x_ref, w1_ref, b1_ref, w2_ref, b2_ref, w3_ref, b3_ref, o_ref):
    # Layer 1: relu(x @ W1_t + b1)
    h = jnp.dot(x_ref[...], w1_ref[...], preferred_element_type=jnp.float32)
    h = jnp.maximum(h + b1_ref[...], 0.0)
    # Layer 2: relu(h @ W2_t + b2)
    h = jnp.dot(h, w2_ref[...], preferred_element_type=jnp.float32)
    h = jnp.maximum(h + b2_ref[...], 0.0)
    # Output layer (no activation): h @ W3_t + b3
    out = jnp.dot(h, w3_ref[...], preferred_element_type=jnp.float32) + b3_ref[...]
    o_ref[...] = out.astype(o_ref.dtype)   # lane-dense (128-wide) store


# ----------------------------------------------------------------------------
# One-time parameter preparation (padding hoisted out of the forward path).
# ----------------------------------------------------------------------------
def prepare_qnetwork_params(params):
    """Zero-pads every layer's output width to a multiple of 128 (lane-dense).

    Call once at init; the per-call forward reuses the padded arrays, so no
    weight-sized HBM traffic is re-spent on padding/casting every step.
    Zero padding + ReLU(0)=0 keeps the math exactly equivalent.
    """
    (w1, b1), (w2, b2), (w3, b3) = params
    state_dim = int(w1.shape[0])
    action_dim = int(w3.shape[1])
    h1 = _round_up(int(w1.shape[1]), 128)
    h2 = _round_up(int(w2.shape[1]), 128)
    ap = _round_up(action_dim, 128)

    def pad_w(w, rows, cols):
        out = jnp.zeros((rows, cols), jnp.float32)
        return out.at[: w.shape[0], : w.shape[1]].set(w.astype(jnp.float32))

    def pad_b(b, cols):
        out = jnp.zeros((1, cols), jnp.float32)
        return out.at[:, : b.shape[1]].set(b.astype(jnp.float32))

    return dict(
        w1=pad_w(w1, state_dim, h1), b1=pad_b(b1, h1),
        w2=pad_w(w2, h1, h2),        b2=pad_b(b2, h2),
        w3=pad_w(w3, h2, ap),        b3=pad_b(b3, ap),
        state_dim=state_dim, action_dim=action_dim, h1=h1, h2=h2, ap=ap,
    )


def _choose_batch_tiling(B, tile_b):
    """Pick (TB, num_tiles).

    Large tiles amortize the ~0.35us per-grid-step overhead. When more than
    one tile exists, prefer an even tile count so v7x's two TensorCores both
    get work (harmless on single-core v5e/v6e).
    """
    Bp = _round_up(B, 16)
    if Bp <= tile_b:
        return Bp, 1
    TB = max(256, _round_up(min(tile_b, Bp), 256))
    n = _cdiv(Bp, TB)
    if n > 1 and n % 2 == 1:
        TB_even = _round_up(_cdiv(Bp, n + 1), 256)
        if TB_even >= 256 and _cdiv(Bp, TB_even) % 2 == 0:
            TB = TB_even
            n = _cdiv(Bp, TB)
    return TB, n


# ----------------------------------------------------------------------------
# Forward wrapper.
# ----------------------------------------------------------------------------
def qnetwork_forward(x, prepared, *, tile_b=2048, out_dtype=jnp.bfloat16):
    """x: [B, state_dim] f32.  prepared: output of prepare_qnetwork_params()."""
    B, state_dim = x.shape
    assert state_dim == prepared["state_dim"], "state_dim mismatch"
    action_dim = prepared["action_dim"]
    h1, h2, ap = prepared["h1"], prepared["h2"], prepared["ap"]

    TB, num_tiles = _choose_batch_tiling(B, tile_b)
    B_pad = TB * num_tiles

    # Only materialize a padded copy of x when the batch isn't tile-aligned
    # (no dtype cast pass: operands stay f32).
    x_p = x
    if B_pad != B:
        x_p = jnp.zeros((B_pad, state_dim), x.dtype).at[:B].set(x)

    out_bytes = jnp.dtype(out_dtype).itemsize
    flops = 2 * B_pad * (state_dim * h1 + h1 * h2 + h2 * ap)
    bytes_accessed = (
        B_pad * state_dim * 4                                    # x (f32)
        + (state_dim * h1 + h1 * h2 + h2 * ap) * 4               # weights (f32)
        + (h1 + h2 + ap) * 4                                     # biases (f32)
        + B_pad * ap * out_bytes                                 # output
    )

    out = pl.pallas_call(
        qnet_kernel,
        out_shape=jax.ShapeDtypeStruct((B_pad, ap), out_dtype),
        grid_spec=pltpu.PrefetchScalarGridSpec(
            num_scalar_prefetch=0,
            grid=(num_tiles,),
            in_specs=[
                # Streamed batch tile of activations.
                pl.BlockSpec((TB, state_dim), lambda i: (i, 0)),
                # Weights / biases: constant index_map -> DMA'd once,
                # VMEM-resident across the whole grid.
                pl.BlockSpec((state_dim, h1), lambda i: (0, 0)),
                pl.BlockSpec((1, h1), lambda i: (0, 0)),
                pl.BlockSpec((h1, h2), lambda i: (0, 0)),
                pl.BlockSpec((1, h2), lambda i: (0, 0)),
                pl.BlockSpec((h2, ap), lambda i: (0, 0)),
                pl.BlockSpec((1, ap), lambda i: (0, 0)),
            ],
            out_specs=pl.BlockSpec((TB, ap), lambda i: (i, 0)),
        ),
        compiler_params=pltpu.CompilerParams(
            dimension_semantics=("parallel",),     # megacore sharding on v7x
            vmem_limit_bytes=32 * 1024 * 1024,     # headroom under v7x 64 MiB
        ),
        cost_estimate=pl.CostEstimate(
            flops=flops, transcendentals=0, bytes_accessed=bytes_accessed),
    )(x_p, prepared["w1"], prepared["b1"], prepared["w2"], prepared["b2"],
      prepared["w3"], prepared["b3"])

    # Slice away batch and lane padding; return f32 like the PyTorch module.
    return out[:B, :action_dim].astype(jnp.float32)


# ----------------------------------------------------------------------------
# Parameter init mirroring the module's layer shapes, and references.
# ----------------------------------------------------------------------------
def init_qnetwork_params(key, state_dim, action_dim, num_layers=3, max_action_dim=128):
    layer_sizes = np.linspace(state_dim, max_action_dim, num_layers + 1, dtype=int)
    dims = [(int(layer_sizes[i]), int(layer_sizes[i + 1])) for i in range(num_layers - 1)]
    dims.append((int(layer_sizes[num_layers - 1]), action_dim))

    params = []
    for (fan_in, fan_out) in dims:
        key, kw, kb = jax.random.split(key, 3)
        bound = 1.0 / np.sqrt(fan_in)  # PyTorch Linear default init range
        w_t = jax.random.uniform(kw, (fan_in, fan_out), jnp.float32, -bound, bound)
        b = jax.random.uniform(kb, (1, fan_out), jnp.float32, -bound, bound)
        params.append((w_t, b))
    return params


def qnetwork_reference_f32(x, params):
    (w1, b1), (w2, b2), (w3, b3) = params
    h = jnp.maximum(x @ w1 + b1, 0.0)
    h = jnp.maximum(h @ w2 + b2, 0.0)
    return h @ w3 + b3


if __name__ == "__main__":
    # Small shapes consistent with the module:
    # layer_sizes = linspace(32, 128, 4) = [32, 64, 96, 128]
    # middle layers: 32->64, 64->96 ; fc_out: 96->8
    B, state_dim, action_dim = 2, 32, 8
    num_layers, max_action_dim = 3, 128

    key = jax.random.PRNGKey(0)
    key, kx = jax.random.split(key)
    x = jax.random.normal(kx, (B, state_dim), jnp.float32)

    params = init_qnetwork_params(key, state_dim, action_dim,
                                  num_layers=num_layers,
                                  max_action_dim=max_action_dim)
    prepared = prepare_qnetwork_params(params)   # one-time padding, not per call

    out = qnetwork_forward(x, prepared)
    out = jax.block_until_ready(out)

    # f32 operands + f32 accumulation; only the final store is bf16-rounded,
    # so agreement with the f32 PyTorch-equivalent forward is tight.
    ref_f32 = qnetwork_reference_f32(x, params)
    np.testing.assert_allclose(np.asarray(out), np.asarray(ref_f32),
                               rtol=1e-2, atol=1e-2)

    print("KERNEL_OK")
</pallas_src>

<mosaic_0001>
module attributes {stable_mosaic.version = 11 : i64} {
  func.func @qnet_kernel(%arg0: i32, %arg1: memref<16x32xf32, #tpu.memory_space<vmem>>, %arg2: memref<32x128xf32, #tpu.memory_space<vmem>>, %arg3: memref<1x128xf32, #tpu.memory_space<vmem>>, %arg4: memref<128x128xf32, #tpu.memory_space<vmem>>, %arg5: memref<1x128xf32, #tpu.memory_space<vmem>>, %arg6: memref<128x128xf32, #tpu.memory_space<vmem>>, %arg7: memref<1x128xf32, #tpu.memory_space<vmem>>, %arg8: memref<16x128xbf16, #tpu.memory_space<vmem>>) attributes {dimension_semantics = [#tpu.dimension_semantics<parallel>], iteration_bounds = array<i64: 1>, scalar_prefetch = 0 : i64, scratch_operands = 0 : i64, tpu.core_type = #tpu.core_type<tc>, window_params = [{transform_indices = @transform_0, window_bounds = array<i64: 16, 32>}, {pipeline_mode = #tpu.pipeline_mode<synchronous>, transform_indices = @transform_1, window_bounds = array<i64: 32, 128>}, {pipeline_mode = #tpu.pipeline_mode<synchronous>, transform_indices = @transform_2, window_bounds = array<i64: 1, 128>}, {pipeline_mode = #tpu.pipeline_mode<synchronous>, transform_indices = @transform_3, window_bounds = array<i64: 128, 128>}, {pipeline_mode = #tpu.pipeline_mode<synchronous>, transform_indices = @transform_4, window_bounds = array<i64: 1, 128>}, {pipeline_mode = #tpu.pipeline_mode<synchronous>, transform_indices = @transform_5, window_bounds = array<i64: 128, 128>}, {pipeline_mode = #tpu.pipeline_mode<synchronous>, transform_indices = @transform_6, window_bounds = array<i64: 1, 128>}, {transform_indices = @transform_7, window_bounds = array<i64: 16, 128>}]} {
    %c0 = arith.constant 0 : index
    %c0_0 = arith.constant 0 : index
    %0 = vector.load %arg1[%c0, %c0_0] : memref<16x32xf32, #tpu.memory_space<vmem>>, vector<16x32xf32>
    %c0_1 = arith.constant 0 : index
    %c0_2 = arith.constant 0 : index
    %1 = vector.load %arg2[%c0_1, %c0_2] : memref<32x128xf32, #tpu.memory_space<vmem>>, vector<32x128xf32>
    %cst = arith.constant dense<0.000000e+00> : vector<16x128xf32>
    %2 = tpu.matmul %0, %1, %cst {dimension_numbers = #tpu.dot_dimension_numbers<[1], [0], [0], [1], [0, 0, 1, 1], [], []>} : vector<16x32xf32>, vector<32x128xf32>, vector<16x128xf32> -> vector<16x128xf32>
    %c0_3 = arith.constant 0 : index
    %c0_4 = arith.constant 0 : index
    %3 = vector.load %arg3[%c0_3, %c0_4] : memref<1x128xf32, #tpu.memory_space<vmem>>, vector<1x128xf32>
    %4 = vector.broadcast %3 : vector<1x128xf32> to vector<16x128xf32>
    %5 = arith.addf %2, %4 : vector<16x128xf32>
    %cst_5 = arith.constant 0.000000e+00 : f32
    %6 = vector.broadcast %cst_5 : f32 to vector<16x128xf32>
    %7 = arith.maximumf %5, %6 : vector<16x128xf32>
    %c0_6 = arith.constant 0 : index
    %c0_7 = arith.constant 0 : index
    %8 = vector.load %arg4[%c0_6, %c0_7] : memref<128x128xf32, #tpu.memory_space<vmem>>, vector<128x128xf32>
    %cst_8 = arith.constant dense<0.000000e+00> : vector<16x128xf32>
    %9 = tpu.matmul %7, %8, %cst_8 {dimension_numbers = #tpu.dot_dimension_numbers<[1], [0], [0], [1], [0, 0, 1, 1], [], []>} : vector<16x128xf32>, vector<128x128xf32>, vector<16x128xf32> -> vector<16x128xf32>
    %c0_9 = arith.constant 0 : index
    %c0_10 = arith.constant 0 : index
    %10 = vector.load %arg5[%c0_9, %c0_10] : memref<1x128xf32, #tpu.memory_space<vmem>>, vector<1x128xf32>
    %11 = vector.broadcast %10 : vector<1x128xf32> to vector<16x128xf32>
    %12 = arith.addf %9, %11 : vector<16x128xf32>
    %cst_11 = arith.constant 0.000000e+00 : f32
    %13 = vector.broadcast %cst_11 : f32 to vector<16x128xf32>
    %14 = arith.maximumf %12, %13 : vector<16x128xf32>
    %c0_12 = arith.constant 0 : index
    %c0_13 = arith.constant 0 : index
    %15 = vector.load %arg6[%c0_12, %c0_13] : memref<128x128xf32, #tpu.memory_space<vmem>>, vector<128x128xf32>
    %cst_14 = arith.constant dense<0.000000e+00> : vector<16x128xf32>
    %16 = tpu.matmul %14, %15, %cst_14 {dimension_numbers = #tpu.dot_dimension_numbers<[1], [0], [0], [1], [0, 0, 1, 1], [], []>} : vector<16x128xf32>, vector<128x128xf32>, vector<16x128xf32> -> vector<16x128xf32>
    %c0_15 = arith.constant 0 : index
    %c0_16 = arith.constant 0 : index
    %17 = vector.load %arg7[%c0_15, %c0_16] : memref<1x128xf32, #tpu.memory_space<vmem>>, vector<1x128xf32>
    %18 = vector.broadcast %17 : vector<1x128xf32> to vector<16x128xf32>
    %19 = arith.addf %16, %18 : vector<16x128xf32>
    %20 = arith.truncf %19 : vector<16x128xf32> to vector<16x128xbf16>
    %c0_17 = arith.constant 0 : index
    %c0_18 = arith.constant 0 : index
    %21 = vector.load %arg8[%c0_17, %c0_18] : memref<16x128xbf16, #tpu.memory_space<vmem>>, vector<16x128xbf16>
    tpu.vector_store %arg8[%c0_17, %c0_18], %20 {strides = array<i32>} : memref<16x128xbf16, #tpu.memory_space<vmem>>, vector<16x128xbf16>,
    return
  }
  func.func @transform_0(%arg0: i32) -> (i32, i32) {
    %c0_i32 = arith.constant 0 : i32
    %c0_i32_0 = arith.constant 0 : i32
    return %arg0, %c0_i32 : i32, i32
  }
  func.func @transform_1(%arg0: i32) -> (i32, i32) {
    %c0_i32 = arith.constant 0 : i32
    %c0_i32_0 = arith.constant 0 : i32
    %c0_i32_1 = arith.constant 0 : i32
    return %c0_i32, %c0_i32_0 : i32, i32
  }
  func.func @transform_2(%arg0: i32) -> (i32, i32) {
    %c0_i32 = arith.constant 0 : i32
    %c0_i32_0 = arith.constant 0 : i32
    %c0_i32_1 = arith.constant 0 : i32
    return %c0_i32, %c0_i32_0 : i32, i32
  }
  func.func @transform_3(%arg0: i32) -> (i32, i32) {
    %c0_i32 = arith.constant 0 : i32
    %c0_i32_0 = arith.constant 0 : i32
    %c0_i32_1 = arith.constant 0 : i32
    return %c0_i32, %c0_i32_0 : i32, i32
  }
  func.func @transform_4(%arg0: i32) -> (i32, i32) {
    %c0_i32 = arith.constant 0 : i32
    %c0_i32_0 = arith.constant 0 : i32
    %c0_i32_1 = arith.constant 0 : i32
    return %c0_i32, %c0_i32_0 : i32, i32
  }
  func.func @transform_5(%arg0: i32) -> (i32, i32) {
    %c0_i32 = arith.constant 0 : i32
    %c0_i32_0 = arith.constant 0 : i32
    %c0_i32_1 = arith.constant 0 : i32
    return %c0_i32, %c0_i32_0 : i32, i32
  }
  func.func @transform_6(%arg0: i32) -> (i32, i32) {
    %c0_i32 = arith.constant 0 : i32
    %c0_i32_0 = arith.constant 0 : i32
    %c0_i32_1 = arith.constant 0 : i32
    return %c0_i32, %c0_i32_0 : i32, i32
  }
  func.func @transform_7(%arg0: i32) -> (i32, i32) {
    %c0_i32 = arith.constant 0 : i32
    %c0_i32_0 = arith.constant 0 : i32
    return %arg0, %c0_i32 : i32, i32
  }
}

</mosaic_0001>

<bundles_post_ra>
// kernel: tpu_custom_call.1
= control target key start
LH: loop header
LB: loop body
LE: loop exit
PB: predicated region body
PF: predicated region fallthrough
CT: control target
= control target key end

     0   :  { %12 = vsyncpa [#allocation3], 0  ;;  %s888_s0 = inlined_call_operand.hbm [shape: f32[16,32], index: 0, kind: input, shape index: {}]   ;;  %s889_s1 = inlined_call_operand.hbm [shape: f32[32,128], index: 1, kind: input, shape index: {}]   ;;  %s890_s2 = inlined_call_operand.vmem [shape: f32[1,128], index: 2, kind: input, shape index: {}]   ;;  %s891_s3 = inlined_call_operand.hbm [shape: f32[128,128], index: 3, kind: input, shape index: {}]   ;;  %s892_s4 = inlined_call_operand.vmem [shape: f32[1,128], index: 4, kind: input, shape index: {}]   ;;  %s893_s5 = inlined_call_operand.hbm [shape: f32[128,128], index: 5, kind: input, shape index: {}]   ;;  %s894_s6 = inlined_call_operand.vmem [shape: f32[1,128], index: 6, kind: input, shape index: {}]   ;;  %s895_s7 = inlined_call_operand.hbm [shape: bf16[16,128], index: 7, kind: output, shape index: {}]  }
   0x1   :  { %13 = vsyncpa [#allocation6], 0 }
   0x2   :  { %14 = vsyncpa [#allocation9], 0 }
   0x3   :  { %15 = vsyncpa [#allocation4], 0  ;;  %s742_s24 = smov [#allocation5]   ;;  %s743_s26 = smov [#allocation2]  }
   0x4   :  { %s33_s25 = sshll.u32 %s742_s24, 4  ;;  %s21_s27 = sshll.u32 %s743_s26, 4  ;;  %s34_s25 = int_to_ptr.vmem [resolvable:$true] %s33_s25  ;;  %s791_s27 = int_to_ptr.vmem [resolvable:$true] %s21_s27 }
   0x5   :  { %s624_s30 = scalar_lea.hbm %s889_s1, 512 }
   0x6   :  { %p625_p0 = scmp.ne.s32.totalorder %s889_s1, %s624_s30  ;;  %p628_p1 = scmp.lt.u32.totalorder %s624_s30, %s889_s1 }
   0x8   :  { %p630_p2 = pnand %p628_p1, %p625_p0 }
   0xa   :  { %633 = shalt.err (!%p630_p2)
}
   0xb   :  { %s634_s12 = scalar_lea.vmem %s34_s25, 512  ;;  %p639_p4 = scmp.lt.s32.totalorder %s34_s25, %s34_s25 }
   0xc   :  { %p635_p3 = scmp.ne.s32.totalorder %s34_s25, %s634_s12  ;;  %p640_p5 = scmp.lt.s32.totalorder %s634_s12, %s634_s12 }
   0xe   :  { %p641_p6 = por %p640_p5, %p639_p4 }
  0x10   :  { %p642_p7 = pnand %p641_p6, %p635_p3 }
  0x12   :  { %645 = shalt.err (!%p642_p7)
}
  0x13   :  { %s744_s13 = smov 128   ;;  %s745_s14 = smov 8  }
  0x14   :  { %39 = dma.hbm_to_vmem [thread:$0]  %s889_s1, 512, %s34_s25, [#allocation6], %s744_s13, %s744_s13, %s745_s14  }
  0x15   :  { %s646_s19 = scalar_lea.hbm %s888_s0, 256 }
  0x16   :  { %p647_p8 = scmp.ne.s32.totalorder %s888_s0, %s646_s19  ;;  %p650_p9 = scmp.lt.u32.totalorder %s646_s19, %s888_s0 }
  0x18   :  { %p652_p10 = pnand %p650_p9, %p647_p8 }
  0x1a   :  { %655 = shalt.err (!%p652_p10)
}
  0x1b   :  { %s656_s24 = scalar_lea.vmem %s791_s27, 256  ;;  %p661_p12 = scmp.lt.s32.totalorder %s791_s27, %s791_s27 }
  0x1c   :  { %p657_p11 = scmp.ne.s32.totalorder %s791_s27, %s656_s24  ;;  %p662_p13 = scmp.lt.s32.totalorder %s656_s24, %s656_s24 }
  0x1e   :  { %p663_p0 = por %p662_p13, %p661_p12 }
  0x20   :  { %p664_p1 = pnand %p663_p0, %p657_p11 }
  0x22   :  { %667 = shalt.err (!%p664_p1)
}
  0x23   :  { %27 = dma.hbm_to_vmem [thread:$0]  %s888_s0, 256, %s791_s27, [#allocation3], %s744_s13, %s744_s13, %s745_s14  }
  0x24   :  { %s746_s26 = smov [#allocation7]   ;;  %s747_s29 = smov [#allocation8]  }
  0x25   :  { %s47_s28 = sshll.u32 %s746_s26, 4  ;;  %s61_s30 = sshll.u32 %s747_s29, 4  ;;  %s48_s28 = int_to_ptr.vmem [resolvable:$true] %s47_s28  ;;  %s828_s30 = int_to_ptr.vmem [resolvable:$true] %s61_s30 }
  0x26   :  { %s668_s10 = scalar_lea.hbm %s891_s3, 2048 }
  0x27   :  { %p669_p2 = scmp.ne.s32.totalorder %s891_s3, %s668_s10  ;;  %p672_p3 = scmp.lt.u32.totalorder %s668_s10, %s891_s3 }
  0x29   :  { %p674_p4 = pnand %p672_p3, %p669_p2 }
  0x2b   :  { %677 = shalt.err (!%p674_p4)
}
  0x2c   :  { %s678_s0 = scalar_lea.vmem %s48_s28, 2048  ;;  %p683_p6 = scmp.lt.s32.totalorder %s48_s28, %s48_s28 }
  0x2d   :  { %p679_p5 = scmp.ne.s32.totalorder %s48_s28, %s678_s0  ;;  %p684_p7 = scmp.lt.s32.totalorder %s678_s0, %s678_s0 }
  0x2f   :  { %p685_p8 = por %p684_p7, %p683_p6 }
  0x31   :  { %p686_p9 = pnand %p685_p8, %p679_p5 }
  0x33   :  { %689 = shalt.err (!%p686_p9)
}
  0x34   :  { %53 = dma.hbm_to_vmem [thread:$0]  %s891_s3, 2048, %s48_s28, [#allocation6], %s744_s13, %s744_s13, %s745_s14  }
  0x35   :  { %s690_s20 = scalar_lea.hbm %s893_s5, 2048 }
  0x36   :  { %p691_p10 = scmp.ne.s32.totalorder %s893_s5, %s690_s20  ;;  %p694_p11 = scmp.lt.u32.totalorder %s690_s20, %s893_s5 }
  0x38   :  { %p696_p12 = pnand %p694_p11, %p691_p10 }
  0x3a   :  { %699 = shalt.err (!%p696_p12)
}
  0x3b   :  { %s700_s1 = scalar_lea.vmem %s828_s30, 2048  ;;  %p705_p0 = scmp.lt.s32.totalorder %s828_s30, %s828_s30 }
  0x3c   :  { %p701_p13 = scmp.ne.s32.totalorder %s828_s30, %s700_s1  ;;  %p706_p1 = scmp.lt.s32.totalorder %s700_s1, %s700_s1 }
  0x3e   :  { %p707_p2 = por %p706_p1, %p705_p0 }
  0x40   :  { %p708_p3 = pnand %p707_p2, %p701_p13 }
  0x42   :  { %711 = shalt.err (!%p708_p3)
}
  0x43   :  { %67 = dma.hbm_to_vmem [thread:$0]  %s893_s5, 2048, %s828_s30, [#allocation9], %s744_s13, %s744_s13, %s745_s14  }
  0x44   :  { %734 = dma.done.wait [#allocation3], 256  }
  0x45   :  { %735 = vsyncadd [#allocation3], 4294967040 }
  0x46   :  { %736 = dma.done.wait [#allocation6], 2560  }
  0x47   :  { %737 = vsyncadd [#allocation6], 4294964736 }
  0x48   :  { %738 = dma.done.wait [#allocation9], 2048  }
  0x49   :  { %739 = vsyncadd [#allocation9], 4294965248  ;;  %vm95_vm0 = vcmask 261120   ;;  %v84_v0 = vld [vmem:[#allocation5] sm:$0xff]  ;;  %v85_v1 = vld [vmem:[#allocation5 + $0x8] sm:$0xff]  ;;  %s748_s29 = smov [#allocation10]  }
  0x4a   :  { %v86_v2 = vld [vmem:[#allocation5 + $0x10] sm:$0xff]  ;;  %v543_v3 = vpack.c.bf16 %v85_v1, %v84_v0  ;;  %v87_v4 = vld [vmem:[#allocation5 + $0x18] sm:$0xff]  ;;  %v179_v7 = vld [vmem:[#allocation7] sm:$0xff]  ;;  %s392_s30 = sshll.u32 %s748_s29, 4  ;;  %s393_s30 = int_to_ptr.vmem [resolvable:$true] %s392_s30 }
  0x4b   :  { %v82_v5 = vld [vmem:[#allocation2] sm:$0xff]  ;;  %v547_v6 = vpack.c.bf16 %v87_v4, %v86_v2  ;;  %v180_v8 = vld [vmem:[#allocation7 + $0x8] sm:$0xff]  ;;  %v182_v11 = vld [vmem:[#allocation7 + $0x18] sm:$0xff]  ;;  %p717_p5 = scmp.lt.s32.totalorder %s393_s30, %s393_s30 }
  0x4c   :  { %470 = vmatprep.mubr.msk.f32.mxu0 %vm95_vm0, %v82_v5  ;;  %v181_v9 = vld [vmem:[#allocation7 + $0x10] sm:$0xff]  ;;  %544 = vmatprep.subr.bf16.mxu0 %v543_v3  ;;  %v551_v10 = vpack.c.bf16 %v180_v8, %v179_v7  ;;  %v183_v13 = vld [vmem:[#allocation7 + $0x20] sm:$0xff]  ;;  %v184_v14 = vld [vmem:[#allocation7 + $0x28] sm:$0xff] }
  0x4d   :  { %546 = vmatpush3.bf16.msra.mxu0 %v543_v3  ;;  %v555_v12 = vpack.c.bf16 %v182_v11, %v181_v9  ;;  %v559_v15 = vpack.c.bf16 %v184_v14, %v183_v13  ;;  %v83_v16 = vld [vmem:[#allocation2 + $0x8] sm:$0xff]  ;;  %v185_v17 = vld [vmem:[#allocation7 + $0x30] sm:$0xff]  ;;  %v187_v20 = vld [vmem:[#allocation7 + $0x40] sm:$0xff] }
  0x4e   :  { %548 = vmatprep.subr.bf16.mxu0 %v547_v6  ;;  %552 = vmatprep.subr.bf16.mxu1 %v551_v10  ;;  %v186_v18 = vld [vmem:[#allocation7 + $0x38] sm:$0xff]  ;;  %v188_v21 = vld [vmem:[#allocation7 + $0x48] sm:$0xff]  ;;  %v189_v23 = vld [vmem:[#allocation7 + $0x50] sm:$0xff] }
  0x4f   :  { %554 = vmatpush3.bf16.msra.mxu1 %v551_v10  ;;  %v563_v19 = vpack.c.bf16 %v186_v18, %v185_v17  ;;  %v567_v22 = vpack.c.bf16 %v188_v21, %v187_v20  ;;  %v190_v24 = vld [vmem:[#allocation7 + $0x58] sm:$0xff]  ;;  %v191_v26 = vld [vmem:[#allocation7 + $0x60] sm:$0xff]  ;;  %v192_v27 = vld [vmem:[#allocation7 + $0x68] sm:$0xff] }
  0x50   :  { %556 = vmatprep.subr.bf16.mxu1 %v555_v12  ;;  %v571_v25 = vpack.c.bf16 %v190_v24, %v189_v23  ;;  %v575_v28 = vpack.c.bf16 %v192_v27, %v191_v26  ;;  %v193_v29 = vld [vmem:[#allocation7 + $0x70] sm:$0xff]  ;;  %v194_v30 = vld [vmem:[#allocation7 + $0x78] sm:$0xff]  ;;  %v279_v32 = vld [vmem:[#allocation8] sm:$0xff] }
  0x51   :  { %550 = vmatpush3.bf16.msra.mxu0 %v547_v6  ;;  %v579_v31 = vpack.c.bf16 %v194_v30, %v193_v29  ;;  %v280_v33 = vld [vmem:[#allocation8 + $0x8] sm:$0xff]  ;;  %v281_v34 = vld [vmem:[#allocation8 + $0x10] sm:$0xff]  ;;  %v282_v36 = vld [vmem:[#allocation8 + $0x18] sm:$0xff] }
  0x52   :  { %v583_v35 = vpack.c.bf16 %v280_v33, %v279_v32  ;;  %v587_v37 = vpack.c.bf16 %v282_v36, %v281_v34  ;;  %v283_v38 = vld [vmem:[#allocation8 + $0x20] sm:$0xff]  ;;  %v284_v39 = vld [vmem:[#allocation8 + $0x28] sm:$0xff]  ;;  %v285_v41 = vld [vmem:[#allocation8 + $0x30] sm:$0xff] }
  0x53   :  { %558 = vmatpush3.bf16.msra.mxu1 %v555_v12  ;;  %v591_v40 = vpack.c.bf16 %v284_v39, %v283_v38  ;;  %v286_v42 = vld [vmem:[#allocation8 + $0x38] sm:$0xff]  ;;  %v287_v44 = vld [vmem:[#allocation8 + $0x40] sm:$0xff]  ;;  %v288_v45 = vld [vmem:[#allocation8 + $0x48] sm:$0xff] }
  0x54   :  { %471 = vmatmul.mubr.msk.f32.vlgmr.msra.gmra.mrb[0].mxu0 %vm95_vm0, %v83_v16  ;;  %560 = vmatprep.subr.bf16.mxu1 %v559_v15  ;;  %v595_v43 = vpack.c.bf16 %v286_v42, %v285_v41  ;;  %v599_v46 = vpack.c.bf16 %v288_v45, %v287_v44  ;;  %v289_v47 = vld [vmem:[#allocation8 + $0x50] sm:$0xff]  ;;  %v290_v48 = vld [vmem:[#allocation8 + $0x58] sm:$0xff]  ;;  %v291_v50 = vld [vmem:[#allocation8 + $0x60] sm:$0xff] }
  0x55   :  { %584 = vmatprep.subr.bf16.mxu0 %v583_v35  ;;  %v603_v49 = vpack.c.bf16 %v290_v48, %v289_v47  ;;  %v292_v51 = vld [vmem:[#allocation8 + $0x68] sm:$0xff]  ;;  %v406_v53 = vld [vmem:[%s890_s2] ss:$0 sm:$0xff]  ;;  %v294_v61 = vld [vmem:[#allocation8 + $0x78] sm:$0xff] }
  0x56   :  { %586 = vmatpush3.bf16.msra.mxu0 %v583_v35  ;;  %v607_v52 = vpack.c.bf16 %v292_v51, %v291_v50  ;;  %v293_v60 = vld [vmem:[#allocation8 + $0x70] sm:$0xff] }
  0x57   :  { %562 = vmatpush3.bf16.msra.mxu1 %v559_v15  ;;  %588 = vmatprep.subr.bf16.mxu0 %v587_v37  ;;  %v611_v62 = vpack.c.bf16 %v294_v61, %v293_v60  ;;  %v409_v63 = vld [vmem:[%s892_s4] ss:$0 sm:$0xff]  ;;  %s712_s4 = scalar_lea.vmem %s393_s30, 128 }
  0x58   :  { %564 = vmatprep.subr.bf16.mxu1 %v563_v19  ;;  %v410_v6 = vld [vmem:[%s894_s6] ss:$0 sm:$0xff]  ;;  %p713_p4 = scmp.ne.s32.totalorder %s393_s30, %s712_s4  ;;  %p718_p6 = scmp.lt.s32.totalorder %s712_s4, %s712_s4 }
  0x5a   :  { %590 = vmatpush3.bf16.msra.mxu0 %v587_v37  ;;  %p719_p7 = por %p718_p6, %p717_p5 }
  0x5b   :  { %566 = vmatpush3.bf16.msra.mxu1 %v563_v19  ;;  %592 = vmatprep.subr.bf16.mxu0 %v591_v40 }
  0x5c   :  { %568 = vmatprep.subr.bf16.mxu1 %v567_v22  ;;  %p720_p8 = pnand %p719_p7, %p713_p4 }
  0x5e   :  { %594 = vmatpush3.bf16.msra.mxu0 %v591_v40 }
  0x5f   :  { %570 = vmatpush3.bf16.msra.mxu1 %v567_v22  ;;  %596 = vmatprep.subr.bf16.mxu0 %v595_v43 }
  0x60   :  { %572 = vmatprep.subr.bf16.mxu1 %v571_v25 }
  0x62   :  { %598 = vmatpush3.bf16.msra.mxu0 %v595_v43 }
  0x63   :  { %574 = vmatpush3.bf16.msra.mxu1 %v571_v25  ;;  %600 = vmatprep.subr.bf16.mxu0 %v599_v46 }
  0x64   :  { %576 = vmatprep.subr.bf16.mxu1 %v575_v28 }
  0x66   :  { %602 = vmatpush3.bf16.msra.mxu0 %v599_v46 }
  0x67   :  { %578 = vmatpush3.bf16.msra.mxu1 %v575_v28  ;;  %604 = vmatprep.subr.bf16.mxu0 %v603_v49 }
  0x68   :  { %580 = vmatprep.subr.bf16.mxu1 %v579_v31 }
  0x6a   :  { %606 = vmatpush3.bf16.msra.mxu0 %v603_v49 }
  0x6b   :  { %582 = vmatpush3.bf16.msra.mxu1 %v579_v31  ;;  %608 = vmatprep.subr.bf16.mxu0 %v607_v52 }
  0x6e   :  { %610 = vmatpush3.bf16.msra.mxu0 %v607_v52 }
  0x6f   :  { %612 = vmatprep.subr.bf16.mxu0 %v611_v62 }
  0x72   :  { %614 = vmatpush3.bf16.msra.mxu0 %v611_v62 }
 0x127   :  { %v472_v54 = vpop.f32.mrb[0].mxu0 }
 0x128   :  { %v174_v55 = vadd.f32 %v472_v54, %v406_v53  ;;  %v168_v56 = vpop.f32.mrb[1].mxu0 }
 0x129   :  { %v169_v57 = vadd.f32 %v406_v53, %v168_v56 }
 0x12a   :  { %v178_v59 = vmax.f32 %v174_v55, 0.0 }
 0x12b   :  { %v177_v58 = vmax.f32 %v169_v57, 0.0 }
 0x12d   :  { %505 = vmatprep.mubr.f32.mxu1 %v177_v58 }
 0x12e   :  { %506 = vmatmul.mubr.f32.vlgmr.msra.gmra.mrb[0].mxu1 %v178_v59 }
 0x201   :  { %v507_v0 = vpop.f32.mrb[0].mxu1 }
 0x202   :  { %v274_v1 = vadd.f32 %v507_v0, %v409_v63  ;;  %v268_v2 = vpop.f32.mrb[1].mxu1 }
 0x203   :  { %v269_v3 = vadd.f32 %v409_v63, %v268_v2 }
 0x204   :  { %v278_v5 = vmax.f32 %v274_v1, 0.0 }
 0x205   :  { %v277_v4 = vmax.f32 %v269_v3, 0.0 }
 0x207   :  { %540 = vmatprep.mubr.f32.mxu0 %v277_v4 }
 0x208   :  { %541 = vmatmul.mubr.f32.vlgmr.msra.gmra.mrb[2].mxu0 %v278_v5 }
 0x2db   :  { %v542_v7 = vpop.f32.mrb[2].mxu0 }
 0x2dc   :  { %v374_v8 = vadd.f32 %v542_v7, %v410_v6  ;;  %v368_v9 = vpop.f32.mrb[3].mxu0 }
 0x2dd   :  { %v369_v10 = vadd.f32 %v410_v6, %v368_v9 }
 0x2df   :  { %v418_v11 = vpack.c.bf16 %v374_v8, %v369_v10 }
 0x2e1   :  { %419 = vst [vmem:[#allocation10] sm:$0xff] %v418_v11  }
 0x2e2   :  { %723 = shalt.err (!%p720_p8)
}
 0x2e3   :  { %s724_s6 = scalar_lea.hbm %s895_s7, 128 }
 0x2e4   :  { %p725_p9 = scmp.ne.s32.totalorder %s895_s7, %s724_s6  ;;  %p728_p10 = scmp.lt.u32.totalorder %s724_s6, %s895_s7 }
 0x2e6   :  { %p730_p11 = pnand %p728_p10, %p725_p9 }
 0x2e8   :  { %733 = shalt.err (!%p730_p11)
}
 0x2e9   :  { %s749_s16 = smov 64   ;;  %s750_s0 = smov 4  }
 0x2ea   :  { %398 = dma.vmem_to_hbm [thread:$0]  %s393_s30, 128, %s895_s7, [#allocation4], %s749_s16, %s749_s16, %s750_s0  }
 0x2eb   :  { %740 = dma.done.wait [#allocation4], 128  }
 0x2ec   :  { %741 = vsyncadd [#allocation4], 4294967168 }
 0x2ed   :  { %402 = vsyncpa [#allocation3], 1 }
 0x2ee   :  { %403 = vsyncpa [#allocation6], 1 }
 0x2ef   :  { %404 = vsyncpa [#allocation9], 1 }
 0x2f0   :  { %405 = vsyncpa [#allocation4], 1 }

</bundles_post_ra>
